<compile_context>
chip_gen: v7x
topology: tpu7x:2x2x1
jax: 0.10.0
libtpu: 0.0.40
codegen_flags: <defaults>
</compile_context>

<pallas_src>
import numpy as np
import jax
import jax.numpy as jnp
from jax.experimental import pallas as pl
from jax.experimental.pallas import tpu as pltpu

# ----------------------------- configuration --------------------------------
MAX_DEPTH = 3                      # DecisionTreeRegressor(max_depth=3)
N_FEATURES = 8
BATCH = 512
MAX_TILE_B = 4096                  # single grid step up to this many samples

N_NODES = 2 ** (MAX_DEPTH + 1) - 1          # 15 nodes in a complete tree
N_INTERNAL = 2 ** MAX_DEPTH - 1             # 7 internal split nodes
N_LEAVES = 2 ** MAX_DEPTH                   # 8 leaves
N_INT_PAD = 8                               # internal nodes padded to sublane multiple
N_FEAT_PAD = 16                             # features + ones column, sublane-aligned


# ------------------------------- kernel -------------------------------------
def tree_predict_kernel(xt_ref, sel_ref, leaf_ref, o_ref):
    # xt_ref  : (N_FEAT_PAD, TILE_B)   f32  rows 0..F-1: features (batch on lanes),
    #                                       row F: constant 1.0 (threshold fold).
    # sel_ref : (N_INT_PAD, N_FEAT_PAD) f32 row n: one-hot(feature_n) with
    #                                       -threshold_n in column F.
    # leaf_ref: (N_LEAVES, 1)          f32  leaf values in complete-tree order.
    # o_ref   : (1, TILE_B)            f32  predictions (lane-dense block).

    # One MXU pass: row n of fv is (x[feature_n] - threshold_n) for every sample.
    fv = jnp.dot(sel_ref[...], xt_ref[...], preferred_element_type=jnp.float32)
    go_right = (fv > 0.0).astype(jnp.float32)          # (8, TILE_B), 1.0 == go right

    # Branch-free traversal via static-row selects (complete tree, nodes 0..6).
    b0 = go_right[0:1, :]                                          # decision at node 0
    b1 = jnp.where(b0 > 0.5, go_right[2:3, :], go_right[1:2, :])   # node 1 or 2
    c_l = jnp.where(b1 > 0.5, go_right[4:5, :], go_right[3:4, :])  # node 3 or 4
    c_r = jnp.where(b1 > 0.5, go_right[6:7, :], go_right[5:6, :])  # node 5 or 6
    b2 = jnp.where(b0 > 0.5, c_r, c_l)

    # Leaf gather: leaf index = 4*b0 + 2*b1 + b2, resolved by nested selects
    # ((1,1) leaf values broadcast against the (1, TILE_B) condition).
    leaf = leaf_ref[...]
    s0 = jnp.where(b2 > 0.5, leaf[1:2, :], leaf[0:1, :])
    s1 = jnp.where(b2 > 0.5, leaf[3:4, :], leaf[2:3, :])
    s2 = jnp.where(b2 > 0.5, leaf[5:6, :], leaf[4:5, :])
    s3 = jnp.where(b2 > 0.5, leaf[7:8, :], leaf[6:7, :])
    t0 = jnp.where(b1 > 0.5, s1, s0)
    t1 = jnp.where(b1 > 0.5, s3, s2)
    o_ref[...] = jnp.where(b0 > 0.5, t1, t0)


# ------------------------------ tree build -----------------------------------
def build_tree():
    """Deterministic complete decision tree of depth MAX_DEPTH (synthetic)."""
    feature = np.zeros(N_NODES, np.int32)
    threshold = np.zeros(N_NODES, np.float32)
    left = np.zeros(N_NODES, np.int32)
    right = np.zeros(N_NODES, np.int32)
    value = np.zeros(N_NODES, np.float32)
    is_leaf = np.zeros(N_NODES, np.float32)

    for n in range(N_NODES):
        if n < N_INTERNAL:                       # internal split node
            feature[n] = n % N_FEATURES
            threshold[n] = 0.1 * (n + 1) - 0.4   # deterministic thresholds
            left[n] = 2 * n + 1
            right[n] = 2 * n + 2
        else:                                    # leaf
            left[n] = n
            right[n] = n
            value[n] = float(n - N_INTERNAL) * 0.5 - 1.0
            is_leaf[n] = 1.0

    # Packed kernel params: one-hot feature selector with folded -threshold.
    sel_ext = np.zeros((N_INT_PAD, N_FEAT_PAD), np.float32)
    sel_ext[np.arange(N_INTERNAL), feature[:N_INTERNAL]] = 1.0
    sel_ext[np.arange(N_INTERNAL), N_FEATURES] = -threshold[:N_INTERNAL]
    leaf_vals = value[N_INTERNAL:].reshape(N_LEAVES, 1).astype(np.float32)

    # TODO(synk): a fitted sklearn tree that is not a complete depth-d tree
    # must be canonicalized host-side (duplicate leaf values down missing
    # subtrees) before packing into sel_ext / leaf_vals.
    return (feature, threshold, left, right, value, is_leaf,
            jnp.asarray(sel_ext), jnp.asarray(leaf_vals))


# ------------------------------ wrapper --------------------------------------
@jax.jit
def tree_predict(x, sel_ext, leaf_vals):
    b, f = x.shape
    assert f == N_FEATURES
    # Single grid step for small batches; tile only for very large batches.
    tile_b = min(pl.cdiv(b, 128) * 128, MAX_TILE_B)
    bp = pl.cdiv(b, tile_b) * tile_b
    n_steps = bp // tile_b

    xt = x.astype(jnp.float32).T                                   # (F, b)
    if bp != b:                                                    # pad only if needed
        xt = jnp.pad(xt, ((0, 0), (0, bp - b)))
    ones = jnp.ones((1, bp), jnp.float32)                          # threshold-fold row
    pad_rows = jnp.zeros((N_FEAT_PAD - N_FEATURES - 1, bp), jnp.float32)
    xt_ext = jnp.concatenate([xt, ones, pad_rows], axis=0)         # (N_FEAT_PAD, bp)

    out = pl.pallas_call(
        tree_predict_kernel,
        out_shape=jax.ShapeDtypeStruct((1, bp), jnp.float32),
        grid_spec=pltpu.PrefetchScalarGridSpec(
            num_scalar_prefetch=0,
            grid=(n_steps,),
            in_specs=[
                pl.BlockSpec((N_FEAT_PAD, tile_b), lambda i: (0, i)),
                pl.BlockSpec((N_INT_PAD, N_FEAT_PAD), lambda i: (0, 0)),
                pl.BlockSpec((N_LEAVES, 1), lambda i: (0, 0)),
            ],
            out_specs=pl.BlockSpec((1, tile_b), lambda i: (0, i)),
        ),
        compiler_params=pltpu.CompilerParams(
            dimension_semantics=(
                ("parallel",) if n_steps > 1 else ("arbitrary",))),
    )(xt_ext, sel_ext, leaf_vals)
    return out[0, :b]            # 1-D (n_samples,) like sklearn's predict


def reference_predict(x_np, feature, threshold, left, right, value, is_leaf):
    """Plain numpy tree traversal (sklearn semantics) for validation."""
    preds = np.zeros(x_np.shape[0], np.float32)
    for i in range(x_np.shape[0]):
        n = 0
        while is_leaf[n] < 0.5:
            n = left[n] if x_np[i, feature[n]] <= threshold[n] else right[n]
        preds[i] = value[n]
    return preds


if __name__ == "__main__":
    (feature, threshold, left, right, value, is_leaf,
     sel_ext, leaf_vals) = build_tree()

    key = jax.random.PRNGKey(0)
    x = jax.random.normal(key, (BATCH, N_FEATURES), dtype=jnp.float32)

    y = tree_predict(x, sel_ext, leaf_vals)
    jax.block_until_ready(y)

    y_ref = reference_predict(np.asarray(x), feature, threshold, left, right,
                              value, is_leaf)
    np.testing.assert_allclose(np.asarray(y), y_ref, rtol=1e-5, atol=1e-5)

    # TODO(synk): sklearn's predict returns float64; kernel emits float32.
    print("KERNEL_OK")
</pallas_src>

<mosaic_0001>
module attributes {stable_mosaic.version = 11 : i64} {
  func.func @tree_predict_kernel(%arg0: i32, %arg1: memref<16x512xf32, #tpu.memory_space<vmem>>, %arg2: memref<8x16xf32, #tpu.memory_space<vmem>>, %arg3: memref<8x1xf32, #tpu.memory_space<vmem>>, %arg4: memref<1x512xf32, #tpu.memory_space<vmem>>) attributes {dimension_semantics = [#tpu.dimension_semantics<arbitrary>], iteration_bounds = array<i64: 1>, scalar_prefetch = 0 : i64, scratch_operands = 0 : i64, tpu.core_type = #tpu.core_type<tc>, window_params = [{transform_indices = @transform_0, window_bounds = array<i64: 16, 512>}, {pipeline_mode = #tpu.pipeline_mode<synchronous>, transform_indices = @transform_1, window_bounds = array<i64: 8, 16>}, {pipeline_mode = #tpu.pipeline_mode<synchronous>, transform_indices = @transform_2, window_bounds = array<i64: 8, 1>}, {transform_indices = @transform_3, window_bounds = array<i64: 1, 512>}]} {
    %c0 = arith.constant 0 : index
    %c0_0 = arith.constant 0 : index
    %0 = vector.load %arg2[%c0, %c0_0] : memref<8x16xf32, #tpu.memory_space<vmem>>, vector<8x16xf32>
    %c0_1 = arith.constant 0 : index
    %c0_2 = arith.constant 0 : index
    %1 = vector.load %arg1[%c0_1, %c0_2] : memref<16x512xf32, #tpu.memory_space<vmem>>, vector<16x512xf32>
    %cst = arith.constant dense<0.000000e+00> : vector<8x512xf32>
    %2 = tpu.matmul %0, %1, %cst {dimension_numbers = #tpu.dot_dimension_numbers<[1], [0], [0], [1], [0, 0, 1, 1], [], []>} : vector<8x16xf32>, vector<16x512xf32>, vector<8x512xf32> -> vector<8x512xf32>
    %cst_3 = arith.constant 0.000000e+00 : f32
    %3 = vector.broadcast %cst_3 : f32 to vector<8x512xf32>
    %4 = arith.cmpf ogt, %2, %3 : vector<8x512xf32>
    %5 = arith.extui %4 : vector<8x512xi1> to vector<8x512xi32>
    %6 = arith.sitofp %5 : vector<8x512xi32> to vector<8x512xf32>
    %7 = vector.extract_strided_slice %6 {offsets = [0, 0], sizes = [1, 512], strides = [1, 1]} : vector<8x512xf32> to vector<1x512xf32>
    %cst_4 = arith.constant 5.000000e-01 : f32
    %8 = vector.broadcast %cst_4 : f32 to vector<1x512xf32>
    %9 = arith.cmpf ogt, %7, %8 : vector<1x512xf32>
    %10 = vector.extract_strided_slice %6 {offsets = [2, 0], sizes = [1, 512], strides = [1, 1]} : vector<8x512xf32> to vector<1x512xf32>
    %11 = vector.extract_strided_slice %6 {offsets = [1, 0], sizes = [1, 512], strides = [1, 1]} : vector<8x512xf32> to vector<1x512xf32>
    %12 = arith.select %9, %10, %11 : vector<1x512xi1>, vector<1x512xf32>
    %cst_5 = arith.constant 5.000000e-01 : f32
    %13 = vector.broadcast %cst_5 : f32 to vector<1x512xf32>
    %14 = arith.cmpf ogt, %12, %13 : vector<1x512xf32>
    %15 = vector.extract_strided_slice %6 {offsets = [4, 0], sizes = [1, 512], strides = [1, 1]} : vector<8x512xf32> to vector<1x512xf32>
    %16 = vector.extract_strided_slice %6 {offsets = [3, 0], sizes = [1, 512], strides = [1, 1]} : vector<8x512xf32> to vector<1x512xf32>
    %17 = arith.select %14, %15, %16 : vector<1x512xi1>, vector<1x512xf32>
    %cst_6 = arith.constant 5.000000e-01 : f32
    %18 = vector.broadcast %cst_6 : f32 to vector<1x512xf32>
    %19 = arith.cmpf ogt, %12, %18 : vector<1x512xf32>
    %20 = vector.extract_strided_slice %6 {offsets = [6, 0], sizes = [1, 512], strides = [1, 1]} : vector<8x512xf32> to vector<1x512xf32>
    %21 = vector.extract_strided_slice %6 {offsets = [5, 0], sizes = [1, 512], strides = [1, 1]} : vector<8x512xf32> to vector<1x512xf32>
    %22 = arith.select %19, %20, %21 : vector<1x512xi1>, vector<1x512xf32>
    %cst_7 = arith.constant 5.000000e-01 : f32
    %23 = vector.broadcast %cst_7 : f32 to vector<1x512xf32>
    %24 = arith.cmpf ogt, %7, %23 : vector<1x512xf32>
    %25 = arith.select %24, %22, %17 : vector<1x512xi1>, vector<1x512xf32>
    %c0_8 = arith.constant 0 : index
    %c0_9 = arith.constant 0 : index
    %26 = vector.load %arg3[%c0_8, %c0_9] : memref<8x1xf32, #tpu.memory_space<vmem>>, vector<8x1xf32>
    %cst_10 = arith.constant 5.000000e-01 : f32
    %27 = vector.broadcast %cst_10 : f32 to vector<1x512xf32>
    %28 = arith.cmpf ogt, %25, %27 : vector<1x512xf32>
    %29 = vector.extract_strided_slice %26 {offsets = [1, 0], sizes = [1, 1], strides = [1, 1]} : vector<8x1xf32> to vector<1x1xf32>
    %30 = vector.extract_strided_slice %26 {offsets = [0, 0], sizes = [1, 1], strides = [1, 1]} : vector<8x1xf32> to vector<1x1xf32>
    %31 = vector.shape_cast %29 : vector<1x1xf32> to vector<1x1xf32>
    %32 = vector.broadcast %31 : vector<1x1xf32> to vector<1x512xf32>
    %33 = vector.shape_cast %30 : vector<1x1xf32> to vector<1x1xf32>
    %34 = vector.broadcast %33 : vector<1x1xf32> to vector<1x512xf32>
    %35 = arith.select %28, %32, %34 : vector<1x512xi1>, vector<1x512xf32>
    %cst_11 = arith.constant 5.000000e-01 : f32
    %36 = vector.broadcast %cst_11 : f32 to vector<1x512xf32>
    %37 = arith.cmpf ogt, %25, %36 : vector<1x512xf32>
    %38 = vector.extract_strided_slice %26 {offsets = [3, 0], sizes = [1, 1], strides = [1, 1]} : vector<8x1xf32> to vector<1x1xf32>
    %39 = vector.extract_strided_slice %26 {offsets = [2, 0], sizes = [1, 1], strides = [1, 1]} : vector<8x1xf32> to vector<1x1xf32>
    %40 = vector.shape_cast %38 : vector<1x1xf32> to vector<1x1xf32>
    %41 = vector.broadcast %40 : vector<1x1xf32> to vector<1x512xf32>
    %42 = vector.shape_cast %39 : vector<1x1xf32> to vector<1x1xf32>
    %43 = vector.broadcast %42 : vector<1x1xf32> to vector<1x512xf32>
    %44 = arith.select %37, %41, %43 : vector<1x512xi1>, vector<1x512xf32>
    %cst_12 = arith.constant 5.000000e-01 : f32
    %45 = vector.broadcast %cst_12 : f32 to vector<1x512xf32>
    %46 = arith.cmpf ogt, %25, %45 : vector<1x512xf32>
    %47 = vector.extract_strided_slice %26 {offsets = [5, 0], sizes = [1, 1], strides = [1, 1]} : vector<8x1xf32> to vector<1x1xf32>
    %48 = vector.extract_strided_slice %26 {offsets = [4, 0], sizes = [1, 1], strides = [1, 1]} : vector<8x1xf32> to vector<1x1xf32>
    %49 = vector.shape_cast %47 : vector<1x1xf32> to vector<1x1xf32>
    %50 = vector.broadcast %49 : vector<1x1xf32> to vector<1x512xf32>
    %51 = vector.shape_cast %48 : vector<1x1xf32> to vector<1x1xf32>
    %52 = vector.broadcast %51 : vector<1x1xf32> to vector<1x512xf32>
    %53 = arith.select %46, %50, %52 : vector<1x512xi1>, vector<1x512xf32>
    %cst_13 = arith.constant 5.000000e-01 : f32
    %54 = vector.broadcast %cst_13 : f32 to vector<1x512xf32>
    %55 = arith.cmpf ogt, %25, %54 : vector<1x512xf32>
    %56 = vector.extract_strided_slice %26 {offsets = [7, 0], sizes = [1, 1], strides = [1, 1]} : vector<8x1xf32> to vector<1x1xf32>
    %57 = vector.extract_strided_slice %26 {offsets = [6, 0], sizes = [1, 1], strides = [1, 1]} : vector<8x1xf32> to vector<1x1xf32>
    %58 = vector.shape_cast %56 : vector<1x1xf32> to vector<1x1xf32>
    %59 = vector.broadcast %58 : vector<1x1xf32> to vector<1x512xf32>
    %60 = vector.shape_cast %57 : vector<1x1xf32> to vector<1x1xf32>
    %61 = vector.broadcast %60 : vector<1x1xf32> to vector<1x512xf32>
    %62 = arith.select %55, %59, %61 : vector<1x512xi1>, vector<1x512xf32>
    %cst_14 = arith.constant 5.000000e-01 : f32
    %63 = vector.broadcast %cst_14 : f32 to vector<1x512xf32>
    %64 = arith.cmpf ogt, %12, %63 : vector<1x512xf32>
    %65 = arith.select %64, %44, %35 : vector<1x512xi1>, vector<1x512xf32>
    %cst_15 = arith.constant 5.000000e-01 : f32
    %66 = vector.broadcast %cst_15 : f32 to vector<1x512xf32>
    %67 = arith.cmpf ogt, %12, %66 : vector<1x512xf32>
    %68 = arith.select %67, %62, %53 : vector<1x512xi1>, vector<1x512xf32>
    %cst_16 = arith.constant 5.000000e-01 : f32
    %69 = vector.broadcast %cst_16 : f32 to vector<1x512xf32>
    %70 = arith.cmpf ogt, %7, %69 : vector<1x512xf32>
    %71 = arith.select %70, %68, %65 : vector<1x512xi1>, vector<1x512xf32>
    %c0_17 = arith.constant 0 : index
    %c0_18 = arith.constant 0 : index
    %72 = vector.load %arg4[%c0_17, %c0_18] : memref<1x512xf32, #tpu.memory_space<vmem>>, vector<1x512xf32>
    tpu.vector_store %arg4[%c0_17, %c0_18], %71 {strides = array<i32>} : memref<1x512xf32, #tpu.memory_space<vmem>>, vector<1x512xf32>,
    return
  }
  func.func @transform_0(%arg0: i32) -> (i32, i32) {
    %c0_i32 = arith.constant 0 : i32
    %c0_i32_0 = arith.constant 0 : i32
    return %c0_i32, %arg0 : i32, i32
  }
  func.func @transform_1(%arg0: i32) -> (i32, i32) {
    %c0_i32 = arith.constant 0 : i32
    %c0_i32_0 = arith.constant 0 : i32
    %c0_i32_1 = arith.constant 0 : i32
    return %c0_i32, %c0_i32_0 : i32, i32
  }
  func.func @transform_2(%arg0: i32) -> (i32, i32) {
    %c0_i32 = arith.constant 0 : i32
    %c0_i32_0 = arith.constant 0 : i32
    %c0_i32_1 = arith.constant 0 : i32
    return %c0_i32, %c0_i32_0 : i32, i32
  }
  func.func @transform_3(%arg0: i32) -> (i32, i32) {
    %c0_i32 = arith.constant 0 : i32
    %c0_i32_0 = arith.constant 0 : i32
    return %c0_i32, %arg0 : i32, i32
  }
}

</mosaic_0001>

<bundles_post_ra>
// kernel: tree_predict.1
= control target key start
LH: loop header
LB: loop body
LE: loop exit
PB: predicated region body
PF: predicated region fallthrough
CT: control target
= control target key end

     0   :  { %v401_v7 = vmov 0.0   ;;  %v402_v12 = vmov 0   ;;  %s615_s0 = inlined_call_operand.vmem [shape: f32[16,512], index: 0, kind: input, shape index: {}]   ;;  %s616_s1 = inlined_call_operand.vmem [shape: f32[8,16], index: 1, kind: input, shape index: {}]   ;;  %s617_s2 = inlined_call_operand.vmem [shape: f32[8,1], index: 2, kind: input, shape index: {}]   ;;  %s618_s3 = inlined_call_operand.hbm [shape: f32[1,512], index: 3, kind: output, shape index: {}]  }
   0x1   :  { %v17_v0 = vld [vmem:[%s615_s0 + $0x8] sm:$0xff]  ;;  %v19_v2 = vld [vmem:[%s615_s0 + $0x18] sm:$0xff]  ;;  %v16_v5 = vld [vmem:[%s615_s0] sm:$0xff]  ;;  %92 = vmatprep.mubr.f32.mxu0 %v401_v7  ;;  %163 = vmatprep.mubr.f32.mxu1 %v401_v7 }
   0x2   :  { %v21_v1 = vld [vmem:[%s615_s0 + $0x28] sm:$0xff]  ;;  %v23_v4 = vld [vmem:[%s615_s0 + $0x38] sm:$0xff]  ;;  %v20_v6 = vld [vmem:[%s615_s0 + $0x20] sm:$0xff]  ;;  %376 = vset.pattern.permute.xlu0 %v402_v12 }
   0x3   :  { %v364_v3 = vpack.c.bf16 %v21_v1, %v17_v0  ;;  %v368_v8 = vpack.c.bf16 %v23_v4, %v19_v2  ;;  %v366_v9 = vpack.c.bf16 %v20_v6, %v16_v5  ;;  %v18_v10 = vld [vmem:[%s615_s0 + $0x10] sm:$0xff]  ;;  %v258_v14 = vld [vmem:[%s617_s2] sm:$0xff] }
   0x4   :  { %v22_v11 = vld [vmem:[%s615_s0 + $0x30] sm:$0xff] }
   0x5   :  { %365 = vmatprep.subr.bf16.mxu0 %v364_v3  ;;  %v370_v13 = vpack.c.bf16 %v22_v11, %v18_v10 }
   0x6   :  { %8 = vsyncpa [#allocation3], 0  ;;  %369 = vmatprep.subr.bf16.mxu1 %v368_v8  ;;  %367 = vmatpush1.bf16.msra.mxu0 %v366_v9  ;;  %v15_v15 = vld [vmem:[%s616_s1] sm:$0xff]  ;;  %vm24_vm0 = vcmask 130048   ;;  %v403_v16 = vmov 1966171168   ;;  %v319_v18 = vlaneseq }
   0x7   :  { %371 = vmatpush1.bf16.msra.mxu1 %v370_v13  ;;  %265 = vperm.xlu0 %376, %v258_v14   ;;  %v317_v17 = vunpack.c.l.s4 %v403_v16  ;;  %s404_s0 = smov [#allocation2]  }
   0x8   :  { %v320_v20 = vshrl.u32 %v319_v18, 7  ;;  %s350_s1 = sshll.u32 %s404_s0, 4  ;;  %s351_s1 = int_to_ptr.vmem [resolvable:$true] %s350_s1 }
   0x9   :  { %358 = vmatmul.mubr.msk.f32.vlgmr.msra.gmra.mrb[0].mxu0 %vm24_vm0, %v15_v15  ;;  %v318_v19 = vunpack.c.0.s8 %v317_v17  ;;  %s377_s2 = scalar_lea.vmem %s351_s1, 64  ;;  %p382_p1 = scmp.lt.s32.totalorder %s351_s1, %s351_s1 }
   0xa   :  { %359 = vmatmul.mubr.msk.f32.vlgmr.msra.gmra.mrb[0].mxu1 %vm24_vm0, %v15_v15  ;;  %p378_p0 = scmp.ne.s32.totalorder %s351_s1, %s377_s2  ;;  %p383_p2 = scmp.lt.s32.totalorder %s377_s2, %s377_s2 }
   0xb   :  { %v469_v26 = vsub.s32 %v318_v19, %v320_v20 }
   0xc   :  { %p384_p3 = por %p383_p2, %p382_p1 }
   0xe   :  { %p385_p4 = pnand %p384_p3, %p378_p0 }
  0x86   :  { %v458_v21 = vpop.permute.xlu0 %265 }
  0x87   :  { %v461_v23 = vrot.slane %v458_v21, 1  ;;  %v464_v24 = vrot.slane %v458_v21, 3  ;;  %v467_v25 = vrot.slane %v458_v21, 2  ;;  %v472_v29 = vrot.slane %v458_v21, 5 }
  0x88   :  { %v475_v30 = vrot.slane %v458_v21, 4  ;;  %v478_v31 = vrot.slane %v458_v21, 7  ;;  %v484_v34 = vrot.slane %v458_v21, 6 }
  0xdc   :  { %v94_v22 = vpop.f32.mrb[0].mxu0 }
  0xdd   :  { %vm170_vm1 = vcmp.gt.f32.partialorder %v94_v22, 0.0  ;;  %v165_v27 = vpop.f32.mrb[0].mxu1  ;;  %v96_v28 = vpop.f32.mrb[1].mxu0 }
  0xde   :  { %v481_v32 = vsel %vm170_vm1, 1.0, %v401_v7  ;;  %vm172_vm2 = vcmp.gt.f32.partialorder %v165_v27, 0.0  ;;  %vm171_vm3 = vcmp.gt.f32.partialorder %v96_v28, 0.0  ;;  %v167_v33 = vpop.f32.mrb[1].mxu1  ;;  %vm341_vm1 = vcmp.lt.s32.totalorder %v319_v18, 512 }
  0xdf   :  { %v190_v35 = vrot.slane %v481_v32, 2  ;;  %v198_v36 = vrot.slane %v481_v32, 1  ;;  %v214_v37 = vrot.slane %v481_v32, 4  ;;  %v222_v38 = vrot.slane %v481_v32, 3 }
  0xe0   :  { %v234_v39 = vrot.slane %v481_v32, 6  ;;  %v242_v40 = vrot.slane %v481_v32, 5  ;;  %v493_v41 = vsel %vm172_vm2, 1.0, %v401_v7  ;;  %v496_v42 = vsel %vm171_vm3, 1.0, %v401_v7 }
  0xe1   :  { %v192_v43 = vrot.slane %v493_v41, 2  ;;  %v200_v44 = vrot.slane %v493_v41, 1  ;;  %v216_v45 = vrot.slane %v493_v41, 4  ;;  %v224_v46 = vrot.slane %v493_v41, 3 }
  0xe2   :  { %v236_v47 = vrot.slane %v493_v41, 6  ;;  %v244_v48 = vrot.slane %v493_v41, 5  ;;  %v191_v49 = vrot.slane %v496_v42, 2  ;;  %v199_v50 = vrot.slane %v496_v42, 1 }
  0xe3   :  { %v215_v51 = vrot.slane %v496_v42, 4  ;;  %v223_v52 = vrot.slane %v496_v42, 3  ;;  %v235_v53 = vrot.slane %v496_v42, 6  ;;  %v243_v54 = vrot.slane %v496_v42, 5 }
  0xe4   :  { %vm173_vm4 = vcmp.gt.f32.partialorder %v167_v33, 0.0  ;;  %vm182_vm5 = vcmp.gt.f32.partialorder %v481_v32, 0.5  ;;  %vm183_vm6 = vcmp.gt.f32.partialorder %v496_v42, 0.5  ;;  %vm184_vm7 = vcmp.gt.f32.partialorder %v493_v41, 0.5 }
  0xe5   :  { %v363_v55 = vsel %vm173_vm4, 1.0, %v401_v7  ;;  %v206_v56 = vsel %vm182_vm5, %v190_v35, %v198_v36  ;;  %v207_v57 = vsel %vm183_vm6, %v191_v49, %v199_v50  ;;  %v208_v58 = vsel %vm184_vm7, %v192_v43, %v200_v44 }
  0xe6   :  { %v193_v59 = vrot.slane %v363_v55, 2  ;;  %v201_v60 = vrot.slane %v363_v55, 1  ;;  %v217_v61 = vrot.slane %v363_v55, 4  ;;  %v225_v62 = vrot.slane %v363_v55, 3 }
  0xe7   :  { %v237_v63 = vrot.slane %v363_v55, 6  ;;  %v245_v0 = vrot.slane %v363_v55, 5  ;;  %vm185_vm8 = vcmp.gt.f32.partialorder %v363_v55, 0.5  ;;  %vm210_vm9 = vcmp.gt.f32.partialorder %v206_v56, 0.5 }
  0xe8   :  { %v209_v1 = vsel %vm185_vm8, %v193_v59, %v201_v60  ;;  %vm211_vm10 = vcmp.gt.f32.partialorder %v207_v57, 0.5  ;;  %vm212_vm11 = vcmp.gt.f32.partialorder %v208_v58, 0.5  ;;  %v230_v2 = vsel %vm210_vm9, %v214_v37, %v222_v38 }
  0xe9   :  { %vm213_vm12 = vcmp.gt.f32.partialorder %v209_v1, 0.5  ;;  %v231_v3 = vsel %vm211_vm10, %v215_v51, %v223_v52  ;;  %v232_v4 = vsel %vm212_vm11, %v216_v45, %v224_v46  ;;  %v250_v5 = vsel %vm210_vm9, %v234_v39, %v242_v40 }
  0xea   :  { %v233_v6 = vsel %vm213_vm12, %v217_v61, %v225_v62  ;;  %v251_v7 = vsel %vm211_vm10, %v235_v53, %v243_v54  ;;  %v252_v8 = vsel %vm212_vm11, %v236_v47, %v244_v48  ;;  %v253_v9 = vsel %vm213_vm12, %v237_v63, %v245_v0 }
  0xeb   :  { %v254_v10 = vsel %vm182_vm5, %v250_v5, %v230_v2  ;;  %v255_v11 = vsel %vm183_vm6, %v251_v7, %v231_v3  ;;  %v256_v12 = vsel %vm184_vm7, %v252_v8, %v232_v4  ;;  %v257_v13 = vsel %vm185_vm8, %v253_v9, %v233_v6 }
  0xec   :  { %vm259_vm13 = vcmp.gt.f32.partialorder %v254_v10, 0.5  ;;  %vm260_vm14 = vcmp.gt.f32.partialorder %v255_v11, 0.5  ;;  %vm261_vm15 = vcmp.gt.f32.partialorder %v256_v12, 0.5  ;;  %vm262_vm0 = vcmp.gt.f32.partialorder %v257_v13, 0.5 }
  0xed   :  { %v270_v14 = vsel %vm259_vm13, %v461_v23, %v458_v21  ;;  %v271_v15 = vsel %vm260_vm14, %v461_v23, %v458_v21  ;;  %v272_v16 = vsel %vm261_vm15, %v461_v23, %v458_v21  ;;  %v273_v17 = vsel %vm262_vm0, %v461_v23, %v458_v21 }
  0xee   :  { %v278_v19 = vsel %vm259_vm13, %v464_v24, %v467_v25  ;;  %v279_v20 = vsel %vm260_vm14, %v464_v24, %v467_v25  ;;  %v280_v22 = vsel %vm261_vm15, %v464_v24, %v467_v25  ;;  %v281_v27 = vsel %vm262_vm0, %v464_v24, %v467_v25 }
  0xef   :  { %v286_v21 = vsel %vm259_vm13, %v472_v29, %v475_v30  ;;  %v287_v23 = vsel %vm260_vm14, %v472_v29, %v475_v30  ;;  %v288_v28 = vsel %vm261_vm15, %v472_v29, %v475_v30  ;;  %v289_v33 = vsel %vm262_vm0, %v472_v29, %v475_v30 }
  0xf0   :  { %v294_v24 = vsel %vm259_vm13, %v478_v31, %v484_v34  ;;  %v295_v25 = vsel %vm260_vm14, %v478_v31, %v484_v34  ;;  %v296_v35 = vsel %vm261_vm15, %v478_v31, %v484_v34  ;;  %v297_v36 = vsel %vm262_vm0, %v478_v31, %v484_v34 }
  0xf1   :  { %v298_v37 = vsel %vm210_vm9, %v278_v19, %v270_v14  ;;  %v299_v29 = vsel %vm211_vm10, %v279_v20, %v271_v15  ;;  %v300_v30 = vsel %vm212_vm11, %v280_v22, %v272_v16  ;;  %v301_v38 = vsel %vm213_vm12, %v281_v27, %v273_v17 }
  0xf2   :  { %v302_v39 = vsel %vm210_vm9, %v294_v24, %v286_v21  ;;  %v303_v40 = vsel %vm211_vm10, %v295_v25, %v287_v23  ;;  %v304_v43 = vsel %vm212_vm11, %v296_v35, %v288_v28  ;;  %v305_v44 = vsel %vm213_vm12, %v297_v36, %v289_v33 }
  0xf3   :  { %v306_v45 = vsel %vm182_vm5, %v302_v39, %v298_v37  ;;  %v307_v31 = vsel %vm183_vm6, %v303_v40, %v299_v29  ;;  %v308_v34 = vsel %vm184_vm7, %v304_v43, %v300_v30  ;;  %v309_v46 = vsel %vm185_vm8, %v305_v44, %v301_v38 }
  0xf4   :  { %v314_v47 = vcombine.low %v306_v45, %v307_v31  ;;  %v315_v48 = vcombine.low %v308_v34, %v309_v46 }
  0xf6   :  { %v322_v49 = vrot.slane %v314_v47, %v469_v26  ;;  %v329_v50 = vrot.slane %v315_v48, %v469_v26 }
  0xf8   :  { %v330_v51 = vcombine.low %v322_v49, %v329_v50 }
  0xfa   :  { %v337_v32 = vrot.slane %v330_v51, %v469_v26 }
  0xfc   :  { %343 = vst.msk [vmem:[#allocation2] sm:$0xf] %vm341_vm1, %v337_v32 }
  0xfd   :  { %388 = shalt.err (!%p385_p4)
}
  0xfe   :  { %s389_s7 = scalar_lea.hbm %s618_s3, 64 }
  0xff   :  { %p390_p5 = scmp.ne.s32.totalorder %s618_s3, %s389_s7  ;;  %p393_p6 = scmp.lt.u32.totalorder %s389_s7, %s618_s3 }
 0x101   :  { %p395_p7 = pnand %p393_p6, %p390_p5 }
 0x103   :  { %398 = shalt.err (!%p395_p7)
}
 0x104   :  { %353 = dma.vmem_to_hbm [thread:$0]  %s351_s1, 64, %s618_s3, [#allocation3]  }
 0x105   :  { %399 = dma.done.wait [#allocation3], 64  }
 0x106   :  { %400 = vsyncadd [#allocation3], 4294967232 }
 0x107   :  { %357 = vsyncpa [#allocation3], 1 }

</bundles_post_ra>
